<compile_context>
chip_gen: v5e
topology: v5e:2x2
jax: 0.10.0
libtpu: 0.0.40
codegen_flags: <defaults>
</compile_context>

<pallas_src>
import functools

import jax
import jax.numpy as jnp
from jax.experimental import pallas as pl
from jax.experimental.pallas import tpu as pltpu

EMBED_DIM = 768
HIDDEN = 30
NUM_LABELS = 5
NUM_CLASSES = 3
NUM_OUT = NUM_LABELS * NUM_CLASSES        # 15
BN_EPS = 1e-5


def tc_kernel(x_ref, w1_ref, b1_ref, wh_ref, bh_ref, g_ref, o_ref):
    # x tile: [TB, E] bf16 ; W1' bf16 ; all matmuls accumulate in f32.
    h = jnp.dot(x_ref[...], w1_ref[...], preferred_element_type=jnp.float32)
    h = jnp.maximum(h + b1_ref[...], 0.0)

    # dropout1: identity in eval mode.
    # TODO(synk): training-mode dropout (p=0.2) not implemented; eval semantics used.

    # Fused 5-head projection: [TB, 30] @ [30, 15] + [1, 15]
    logits = jnp.dot(h, wh_ref[...], preferred_element_type=jnp.float32) + bh_ref[...]

    # Vectorized per-head softmax over each 3-class lane group.
    # One row-wide max is used instead of five per-group maxes: mathematically
    # identical, and numerically safe as long as the spread between heads'
    # logits stays well below ~80 (true for this head by construction).
    m = jnp.max(logits, axis=1, keepdims=True)
    e = jnp.exp(logits - m)                                        # [TB, 15]
    # Group sums broadcast to every lane of their group via a constant
    # block-diagonal ones matrix, riding the otherwise idle MXU slot.
    d = jnp.dot(e, g_ref[...], preferred_element_type=jnp.float32)  # [TB, 15]
    o_ref[...] = e * pl.reciprocal(d, approx=True)


def _round_up(v, m):
    return ((v + m - 1) // m) * m


@functools.partial(jax.jit, static_argnames=("tb",))
def tc_model_forward(x, params, tb=2048):
    """x: [B, EMBED_DIM] float32.  Returns tuple of 5 arrays [B, NUM_CLASSES] f32."""
    B = x.shape[0]
    w1, b1, gamma, beta, run_mean, run_var, w_heads, b_heads = params

    # Fold eval-mode BatchNorm1d into the first-layer weights/bias:
    #   BN(x@W1 + b1) = x@(W1*scale) + ((b1 - mean)*scale + beta)
    inv_std = jax.lax.rsqrt(run_var + BN_EPS)                      # [30]
    scale = gamma * inv_std                                        # [30]
    w1f = (w1 * scale[None, :]).astype(jnp.bfloat16)               # [768, 30] bf16
    b1f = ((b1 - run_mean) * scale + beta).reshape(1, HIDDEN)      # [1, 30]  f32
    bhf = b_heads.reshape(1, NUM_OUT)                              # [1, 15]  f32

    # Constant block-diagonal group-sum matrix: G[j,k] = 1 iff same head.
    gid = jnp.arange(NUM_OUT) // NUM_CLASSES
    gmat = (gid[:, None] == gid[None, :]).astype(jnp.float32)      # [15, 15]

    # Stream activations as bf16 (halves the dominant HBM read; the convert
    # fuses with whatever produces x upstream in a real pipeline).
    xb = x.astype(jnp.bfloat16)

    # Batch tile: multiple of 16 (bf16 sublane packing), capped at `tb`, sized
    # to keep >= 4 grid steps when B allows (pipelining + v7x megacore).
    TB = min(int(tb), _round_up((B + 3) // 4, 16))
    TB = max(16, (TB // 16) * 16)

    if B < TB:
        # Tiny batches only (< one tile): negligible pad so the single block
        # is well-defined.  For B >= TB the ragged last block needs no pad:
        # Pallas masks the out-of-range writeback.
        xb = jnp.pad(xb, ((0, TB - B), (0, 0)))
        Bi = TB
    else:
        Bi = B
    grid = (pl.cdiv(Bi, TB),)

    cost = pl.CostEstimate(
        flops=2 * B * (EMBED_DIM * HIDDEN + HIDDEN * NUM_OUT + NUM_OUT * NUM_OUT),
        transcendentals=2 * B * NUM_OUT,
        bytes_accessed=(B * EMBED_DIM * 2                          # x (bf16)
                        + EMBED_DIM * HIDDEN * 2                   # W1' (bf16)
                        + (HIDDEN * NUM_OUT + HIDDEN + NUM_OUT
                           + NUM_OUT * NUM_OUT) * 4                # small f32 consts
                        + B * NUM_OUT * 4),                        # output
    )

    out = pl.pallas_call(
        tc_kernel,
        out_shape=jax.ShapeDtypeStruct((Bi, NUM_OUT), jnp.float32),
        grid=grid,
        in_specs=[
            pl.BlockSpec((TB, EMBED_DIM), lambda i: (i, 0)),       # x: streamed per tile
            pl.BlockSpec((EMBED_DIM, HIDDEN), lambda i: (0, 0)),   # W1' (bf16, resident)
            pl.BlockSpec((1, HIDDEN), lambda i: (0, 0)),           # b1'
            pl.BlockSpec((HIDDEN, NUM_OUT), lambda i: (0, 0)),     # fused head weights
            pl.BlockSpec((1, NUM_OUT), lambda i: (0, 0)),          # fused head biases
            pl.BlockSpec((NUM_OUT, NUM_OUT), lambda i: (0, 0)),    # group-sum matrix
        ],
        out_specs=pl.BlockSpec((TB, NUM_OUT), lambda i: (i, 0)),   # one lane-dense slab
        compiler_params=pltpu.CompilerParams(
            dimension_semantics=("parallel",)),
        cost_estimate=cost,
    )(xb, w1f, b1f, w_heads, bhf, gmat)

    out = out[:B]
    return tuple(out[:, i * NUM_CLASSES:(i + 1) * NUM_CLASSES]
                 for i in range(NUM_LABELS))


def init_params(key):
    ks = jax.random.split(key, 8)
    # dense1: Linear(768, 30) — stored as [in, out]
    w1 = jax.random.normal(ks[0], (EMBED_DIM, HIDDEN), jnp.float32) * 0.02
    b1 = jax.random.normal(ks[1], (HIDDEN,), jnp.float32) * 0.02
    # BatchNorm1d(30): non-trivial running stats to exercise the BN fold
    gamma = 1.0 + 0.1 * jax.random.normal(ks[2], (HIDDEN,), jnp.float32)
    beta = 0.1 * jax.random.normal(ks[3], (HIDDEN,), jnp.float32)
    run_mean = 0.1 * jax.random.normal(ks[4], (HIDDEN,), jnp.float32)
    run_var = jnp.abs(1.0 + 0.1 * jax.random.normal(ks[5], (HIDDEN,), jnp.float32))
    # 5 heads Linear(30, 3), fused into one [30, 15] weight and [15] bias
    w_heads = jax.random.normal(ks[6], (HIDDEN, NUM_OUT), jnp.float32) * 0.1
    b_heads = jax.random.normal(ks[7], (NUM_OUT,), jnp.float32) * 0.1
    return (w1, b1, gamma, beta, run_mean, run_var, w_heads, b_heads)


def ref_forward(x, params):
    """Pure-JAX f32 reference (eval-mode semantics of TCModel)."""
    w1, b1, gamma, beta, run_mean, run_var, w_heads, b_heads = params
    h = x @ w1 + b1
    h = (h - run_mean) / jnp.sqrt(run_var + BN_EPS) * gamma + beta
    h = jnp.maximum(h, 0.0)
    logits = h @ w_heads + b_heads
    return tuple(jax.nn.softmax(logits[:, i * NUM_CLASSES:(i + 1) * NUM_CLASSES], axis=1)
                 for i in range(NUM_LABELS))


if __name__ == "__main__":
    key = jax.random.PRNGKey(0)
    k_param, k_x = jax.random.split(key)
    params = init_params(k_param)

    # B=8: tiny-batch (single padded tile) path.  B=20: ragged multi-step grid
    # (TB=16, grid=2, partial last block) exercising the no-pad path.
    for B in (8, 20):
        x = jax.random.normal(jax.random.fold_in(k_x, B), (B, EMBED_DIM), jnp.float32)
        outs = jax.block_until_ready(tc_model_forward(x, params))
        refs = ref_forward(x, params)
        assert len(outs) == NUM_LABELS
        for o, r in zip(outs, refs):
            assert o.shape == (B, NUM_CLASSES)
            # rows must be (approximately) probability distributions
            assert jnp.allclose(jnp.sum(o, axis=1), 1.0, atol=5e-3)
            # match the f32 reference (bf16 activations + approx recip -> loose tol)
            assert jnp.allclose(o, r, atol=1e-2, rtol=1e-2)

    print("KERNEL_OK")
</pallas_src>

<mosaic_0001>
module attributes {stable_mosaic.version = 11 : i64} {
  func.func @tc_kernel(%arg0: i32, %arg1: memref<16x768xbf16, #tpu.memory_space<vmem>>, %arg2: memref<768x30xbf16, #tpu.memory_space<vmem>>, %arg3: memref<1x30xf32, #tpu.memory_space<vmem>>, %arg4: memref<30x15xf32, #tpu.memory_space<vmem>>, %arg5: memref<1x15xf32, #tpu.memory_space<vmem>>, %arg6: memref<15x15xf32, #tpu.memory_space<vmem>>, %arg7: memref<16x15xf32, #tpu.memory_space<vmem>>) attributes {dimension_semantics = [#tpu.dimension_semantics<parallel>], iteration_bounds = array<i64: 1>, scalar_prefetch = 0 : i64, scratch_operands = 0 : i64, tpu.core_type = #tpu.core_type<tc>, window_params = [{transform_indices = @transform_0, window_bounds = array<i64: 16, 768>}, {pipeline_mode = #tpu.pipeline_mode<synchronous>, transform_indices = @transform_1, window_bounds = array<i64: 768, 30>}, {pipeline_mode = #tpu.pipeline_mode<synchronous>, transform_indices = @transform_2, window_bounds = array<i64: 1, 30>}, {pipeline_mode = #tpu.pipeline_mode<synchronous>, transform_indices = @transform_3, window_bounds = array<i64: 30, 15>}, {pipeline_mode = #tpu.pipeline_mode<synchronous>, transform_indices = @transform_4, window_bounds = array<i64: 1, 15>}, {pipeline_mode = #tpu.pipeline_mode<synchronous>, transform_indices = @transform_5, window_bounds = array<i64: 15, 15>}, {transform_indices = @transform_6, window_bounds = array<i64: 16, 15>}]} {
    %c0 = arith.constant 0 : index
    %c0_0 = arith.constant 0 : index
    %0 = vector.load %arg1[%c0, %c0_0] : memref<16x768xbf16, #tpu.memory_space<vmem>>, vector<16x768xbf16>
    %c0_1 = arith.constant 0 : index
    %c0_2 = arith.constant 0 : index
    %1 = vector.load %arg2[%c0_1, %c0_2] : memref<768x30xbf16, #tpu.memory_space<vmem>>, vector<768x30xbf16>
    %cst = arith.constant dense<0.000000e+00> : vector<16x30xf32>
    %2 = tpu.matmul %0, %1, %cst {dimension_numbers = #tpu.dot_dimension_numbers<[1], [0], [0], [1], [0, 0, 1, 1], [], []>} : vector<16x768xbf16>, vector<768x30xbf16>, vector<16x30xf32> -> vector<16x30xf32>
    %c0_3 = arith.constant 0 : index
    %c0_4 = arith.constant 0 : index
    %3 = vector.load %arg3[%c0_3, %c0_4] : memref<1x30xf32, #tpu.memory_space<vmem>>, vector<1x30xf32>
    %4 = vector.broadcast %3 : vector<1x30xf32> to vector<16x30xf32>
    %5 = arith.addf %2, %4 : vector<16x30xf32>
    %cst_5 = arith.constant 0.000000e+00 : f32
    %6 = vector.broadcast %cst_5 : f32 to vector<16x30xf32>
    %7 = arith.maximumf %5, %6 : vector<16x30xf32>
    %c0_6 = arith.constant 0 : index
    %c0_7 = arith.constant 0 : index
    %8 = vector.load %arg4[%c0_6, %c0_7] : memref<30x15xf32, #tpu.memory_space<vmem>>, vector<30x15xf32>
    %cst_8 = arith.constant dense<0.000000e+00> : vector<16x15xf32>
    %9 = tpu.matmul %7, %8, %cst_8 {dimension_numbers = #tpu.dot_dimension_numbers<[1], [0], [0], [1], [0, 0, 1, 1], [], []>} : vector<16x30xf32>, vector<30x15xf32>, vector<16x15xf32> -> vector<16x15xf32>
    %c0_9 = arith.constant 0 : index
    %c0_10 = arith.constant 0 : index
    %10 = vector.load %arg5[%c0_9, %c0_10] : memref<1x15xf32, #tpu.memory_space<vmem>>, vector<1x15xf32>
    %11 = vector.broadcast %10 : vector<1x15xf32> to vector<16x15xf32>
    %12 = arith.addf %9, %11 : vector<16x15xf32>
    %cst_11 = arith.constant dense<0xFF800000> : vector<16xf32>
    %13 = vector.multi_reduction <maximumf>, %12, %cst_11 [1] : vector<16x15xf32> to vector<16xf32>
    %14 = vector.shape_cast %13 : vector<16xf32> to vector<16x1xf32>
    %15 = vector.broadcast %14 : vector<16x1xf32> to vector<16x15xf32>
    %16 = arith.subf %12, %15 : vector<16x15xf32>
    %17 = math.exp %16 : vector<16x15xf32>
    %c0_12 = arith.constant 0 : index
    %c0_13 = arith.constant 0 : index
    %18 = vector.load %arg6[%c0_12, %c0_13] : memref<15x15xf32, #tpu.memory_space<vmem>>, vector<15x15xf32>
    %cst_14 = arith.constant dense<0.000000e+00> : vector<16x15xf32>
    %19 = tpu.matmul %17, %18, %cst_14 {dimension_numbers = #tpu.dot_dimension_numbers<[1], [0], [0], [1], [0, 0, 1, 1], [], []>} : vector<16x15xf32>, vector<15x15xf32>, vector<16x15xf32> -> vector<16x15xf32>
    %20 = tpu.reciprocal %19 {approx = true} : vector<16x15xf32> -> vector<16x15xf32>
    %21 = arith.mulf %17, %20 : vector<16x15xf32>
    %c0_15 = arith.constant 0 : index
    %c0_16 = arith.constant 0 : index
    %22 = vector.load %arg7[%c0_15, %c0_16] : memref<16x15xf32, #tpu.memory_space<vmem>>, vector<16x15xf32>
    tpu.vector_store %arg7[%c0_15, %c0_16], %21 {strides = array<i32>} : memref<16x15xf32, #tpu.memory_space<vmem>>, vector<16x15xf32>,
    return
  }
  func.func @transform_0(%arg0: i32) -> (i32, i32) {
    %c0_i32 = arith.constant 0 : i32
    %c0_i32_0 = arith.constant 0 : i32
    return %arg0, %c0_i32 : i32, i32
  }
  func.func @transform_1(%arg0: i32) -> (i32, i32) {
    %c0_i32 = arith.constant 0 : i32
    %c0_i32_0 = arith.constant 0 : i32
    %c0_i32_1 = arith.constant 0 : i32
    return %c0_i32, %c0_i32_0 : i32, i32
  }
  func.func @transform_2(%arg0: i32) -> (i32, i32) {
    %c0_i32 = arith.constant 0 : i32
    %c0_i32_0 = arith.constant 0 : i32
    %c0_i32_1 = arith.constant 0 : i32
    return %c0_i32, %c0_i32_0 : i32, i32
  }
  func.func @transform_3(%arg0: i32) -> (i32, i32) {
    %c0_i32 = arith.constant 0 : i32
    %c0_i32_0 = arith.constant 0 : i32
    %c0_i32_1 = arith.constant 0 : i32
    return %c0_i32, %c0_i32_0 : i32, i32
  }
  func.func @transform_4(%arg0: i32) -> (i32, i32) {
    %c0_i32 = arith.constant 0 : i32
    %c0_i32_0 = arith.constant 0 : i32
    %c0_i32_1 = arith.constant 0 : i32
    return %c0_i32, %c0_i32_0 : i32, i32
  }
  func.func @transform_5(%arg0: i32) -> (i32, i32) {
    %c0_i32 = arith.constant 0 : i32
    %c0_i32_0 = arith.constant 0 : i32
    %c0_i32_1 = arith.constant 0 : i32
    return %c0_i32, %c0_i32_0 : i32, i32
  }
  func.func @transform_6(%arg0: i32) -> (i32, i32) {
    %c0_i32 = arith.constant 0 : i32
    %c0_i32_0 = arith.constant 0 : i32
    return %arg0, %c0_i32 : i32, i32
  }
}

</mosaic_0001>

<bundles_post_ra>
// kernel: tc_model_forward.1
= control target key start
LH: loop header
LB: loop body
LE: loop exit
PB: predicated region body
PF: predicated region fallthrough
CT: control target
= control target key end

     0   :  { %vm548_vm0 = vcmask 1045504   ;;  %vm541_vm1 = vcmask 244736   ;;  %vm596_vm2 = vcmask 1046528   ;;  %vm575_vm3 = vcmask 121856   ;;  %s1170_s1 = inlined_call_operand.vmem [shape: bf16[768,30], index: 1, kind: input, shape index: {}]   ;;  %s1171_s2 = inlined_call_operand.vmem [shape: f32[1,30], index: 2, kind: input, shape index: {}]   ;;  %s1172_s0 = inlined_call_operand.vmem [shape: bf16[16,768], index: 0, kind: input, shape index: {}]   ;;  %s1173_s4 = inlined_call_operand.vmem [shape: f32[1,15], index: 4, kind: input, shape index: {}]   ;;  %s1174_s3 = inlined_call_operand.vmem [shape: f32[30,15], index: 3, kind: input, shape index: {}]   ;;  %s1175_s5 = inlined_call_operand.vmem [shape: f32[15,15], index: 5, kind: input, shape index: {}]   ;;  %s1176_s6 = inlined_call_operand.vmem [shape: f32[16,15], index: 6, kind: output, shape index: {}]  }
   0x1   :  { %v868_v0 = vld [vmem:[%s1170_s1 + $0x38] sm:$0xff]  ;;  %v867_v4 = vld [vmem:[%s1170_s1 + $0x30] sm:$0xff]  ;;  %v866_v8 = vld [vmem:[%s1170_s1 + $0x28] sm:$0xff] }
   0x2   :  { %v876_v1 = vld [vmem:[%s1170_s1 + $0x78] sm:$0xff]  ;;  %447 = vmatpush.bf16.msra.mxu0 %v868_v0  ;;  %v875_v5 = vld [vmem:[%s1170_s1 + $0x70] sm:$0xff]  ;;  %v874_v9 = vld [vmem:[%s1170_s1 + $0x68] sm:$0xff] }
   0x3   :  { %v884_v2 = vld [vmem:[%s1170_s1 + $0xb8] sm:$0xff]  ;;  %461 = vmatpush.bf16.msra.mxu1 %v876_v1  ;;  %v883_v6 = vld [vmem:[%s1170_s1 + $0xb0] sm:$0xff]  ;;  %v882_v10 = vld [vmem:[%s1170_s1 + $0xa8] sm:$0xff] }
   0x4   :  { %v892_v3 = vld [vmem:[%s1170_s1 + $0xf8] sm:$0xff]  ;;  %475 = vmatpush.bf16.msra.mxu2 %v884_v2  ;;  %v891_v7 = vld [vmem:[%s1170_s1 + $0xf0] sm:$0xff]  ;;  %v890_v11 = vld [vmem:[%s1170_s1 + $0xe8] sm:$0xff] }
   0x5   :  { %489 = vmatpush.bf16.msra.mxu3 %v892_v3  ;;  %v865_v12 = vld [vmem:[%s1170_s1 + $0x20] sm:$0xff]  ;;  %v864_v16 = vld [vmem:[%s1170_s1 + $0x18] sm:$0xff]  ;;  %v863_v20 = vld [vmem:[%s1170_s1 + $0x10] sm:$0xff] }
   0x6   :  { %448 = vmatpush.bf16.msra.mxu0 %v867_v4  ;;  %v873_v13 = vld [vmem:[%s1170_s1 + $0x60] sm:$0xff]  ;;  %v872_v17 = vld [vmem:[%s1170_s1 + $0x58] sm:$0xff]  ;;  %v871_v21 = vld [vmem:[%s1170_s1 + $0x50] sm:$0xff] }
   0x7   :  { %462 = vmatpush.bf16.msra.mxu1 %v875_v5  ;;  %v881_v14 = vld [vmem:[%s1170_s1 + $0xa0] sm:$0xff]  ;;  %v880_v18 = vld [vmem:[%s1170_s1 + $0x98] sm:$0xff]  ;;  %v879_v22 = vld [vmem:[%s1170_s1 + $0x90] sm:$0xff] }
   0x8   :  { %476 = vmatpush.bf16.msra.mxu2 %v883_v6  ;;  %v889_v15 = vld [vmem:[%s1170_s1 + $0xe0] sm:$0xff]  ;;  %v888_v19 = vld [vmem:[%s1170_s1 + $0xd8] sm:$0xff]  ;;  %v887_v23 = vld [vmem:[%s1170_s1 + $0xd0] sm:$0xff] }
   0x9   :  { %490 = vmatpush.bf16.msra.mxu3 %v891_v7  ;;  %v862_v24 = vld [vmem:[%s1170_s1 + $0x8] sm:$0xff]  ;;  %v861_v28 = vld [vmem:[%s1170_s1] sm:$0xff]  ;;  %v858_v31 = vld [vmem:[%s1172_s0 + $0x14] sm:$0xf0] }
   0xa   :  { %449 = vmatpush.bf16.msra.mxu0 %v866_v8  ;;  %v870_v25 = vld [vmem:[%s1170_s1 + $0x48] sm:$0xff]  ;;  %v869_v29 = vld [vmem:[%s1170_s1 + $0x40] sm:$0xff]  ;;  %v637_v33 = vld [vmem:[%s1172_s0 + $0x18] sm:$0xf0] }
   0xb   :  { %463 = vmatpush.bf16.msra.mxu1 %v874_v9  ;;  %v878_v26 = vld [vmem:[%s1170_s1 + $0x88] sm:$0xff]  ;;  %v635_v30 = vld [vmem:[%s1172_s0] sm:$0xf]  ;;  %v855_v32 = vld [vmem:[%s1172_s0 + $0x4] sm:$0xf] }
   0xc   :  { %477 = vmatpush.bf16.msra.mxu2 %v882_v10  ;;  %v886_v27 = vld [vmem:[%s1170_s1 + $0xc8] sm:$0xff]  ;;  %v900_v34 = vld [vmem:[%s1170_s1 + $0x138] sm:$0xff]  ;;  %v877_v36 = vld [vmem:[%s1170_s1 + $0x80] sm:$0xff]  ;;  %v636_v40 = vor.u32 %v858_v31, %v635_v30  ;;  %v640_v43 = vor.u32 %v855_v32, %v637_v33 }
   0xd   :  { %491 = vmatpush.bf16.msra.mxu3 %v890_v11  ;;  %v908_v35 = vld [vmem:[%s1170_s1 + $0x178] sm:$0xff]  ;;  %v885_v37 = vld [vmem:[%s1170_s1 + $0xc0] sm:$0xff]  ;;  %v643_v38 = vld [vmem:[%s1172_s0 + $0x8] sm:$0xf] }
   0xe   :  { %450 = vmatpush.bf16.msra.mxu0 %v865_v12  ;;  %v859_v39 = vld [vmem:[%s1172_s0 + $0x1c] sm:$0xf0]  ;;  %v856_v41 = vld [vmem:[%s1172_s0 + $0xc] sm:$0xf]  ;;  %v645_v42 = vld [vmem:[%s1172_s0 + $0x20] sm:$0xf0] }
   0xf   :  { %464 = vmatpush.bf16.msra.mxu1 %v873_v13  ;;  %v899_v44 = vld [vmem:[%s1170_s1 + $0x130] sm:$0xff]  ;;  %v644_v46 = vor.u32 %v859_v39, %v643_v38  ;;  %v648_v47 = vor.u32 %v856_v41, %v645_v42  ;;  %v898_v48 = vld [vmem:[%s1170_s1 + $0x128] sm:$0xff]  ;;  %v897_v50 = vld [vmem:[%s1170_s1 + $0x120] sm:$0xff] }
  0x10   :  { %478 = vmatpush.bf16.msra.mxu2 %v881_v14  ;;  %v907_v45 = vld [vmem:[%s1170_s1 + $0x170] sm:$0xff]  ;;  %v906_v49 = vld [vmem:[%s1170_s1 + $0x168] sm:$0xff]  ;;  %v905_v51 = vld [vmem:[%s1170_s1 + $0x160] sm:$0xff] }
  0x11   :  { %492 = vmatpush.bf16.msra.mxu3 %v889_v15  ;;  %v896_v52 = vld [vmem:[%s1170_s1 + $0x118] sm:$0xff]  ;;  %v895_v54 = vld [vmem:[%s1170_s1 + $0x110] sm:$0xff]  ;;  %v894_v56 = vld [vmem:[%s1170_s1 + $0x108] sm:$0xff] }
  0x12   :  { %451 = vmatpush.bf16.msra.mxu0 %v864_v16  ;;  %v904_v53 = vld [vmem:[%s1170_s1 + $0x158] sm:$0xff]  ;;  %v903_v55 = vld [vmem:[%s1170_s1 + $0x150] sm:$0xff]  ;;  %v902_v57 = vld [vmem:[%s1170_s1 + $0x148] sm:$0xff] }
  0x13   :  { %465 = vmatpush.bf16.msra.mxu1 %v872_v17  ;;  %v893_v58 = vld [vmem:[%s1170_s1 + $0x100] sm:$0xff]  ;;  %v651_v60 = vld [vmem:[%s1172_s0 + $0x10] sm:$0xf]  ;;  %v860_v61 = vld [vmem:[%s1172_s0 + $0x24] sm:$0xf0] }
  0x14   :  { %479 = vmatpush.bf16.msra.mxu2 %v880_v18  ;;  %v901_v59 = vld [vmem:[%s1170_s1 + $0x140] sm:$0xff]  ;;  %v857_v62 = vld [vmem:[%s1172_s0 + $0x14] sm:$0xf]  ;;  %v653_v63 = vld [vmem:[%s1172_s0 + $0x28] sm:$0xf0]  ;;  %v652_v0 = vor.u32 %v860_v61, %v651_v60 }
  0x15   :  { %493 = vmatpush.bf16.msra.mxu3 %v888_v19  ;;  %v656_v1 = vor.u32 %v857_v62, %v653_v63  ;;  %v536_v2 = vld [vmem:[%s1174_s3 + $0x18] sm:$0x3f]  ;;  %v535_v3 = vld [vmem:[%s1174_s3 + $0x10] sm:$0xff]  ;;  %v534_v4 = vld [vmem:[%s1174_s3 + $0x8] sm:$0xff] }
  0x16   :  { %452 = vmatpush.bf16.msra.mxu0 %v863_v20  ;;  %v533_v5 = vld [vmem:[%s1174_s3] sm:$0xff]  ;;  %v589_v33 = vld [vmem:[%s1175_s5 + $0x8] sm:$0x7f] }
  0x17   :  { %466 = vmatpush.bf16.msra.mxu1 %v871_v21  ;;  %v909_v8 = vld [vmem:[%s1171_s2] ss:$0 sm:$0xff] }
  0x18   :  { %480 = vmatpush.bf16.msra.mxu2 %v879_v22  ;;  %v588_v41 = vld [vmem:[%s1175_s5] sm:$0xff] }
  0x19   :  { %494 = vmatpush.bf16.msra.mxu3 %v887_v23 }
  0x1a   :  { %453 = vmatpush.bf16.msra.mxu0 %v862_v24 }
  0x1b   :  { %467 = vmatpush.bf16.msra.mxu1 %v870_v25 }
  0x1c   :  { %481 = vmatpush.bf16.msra.mxu2 %v878_v26 }
  0x1d   :  { %495 = vmatpush.bf16.msra.mxu3 %v886_v27 }
  0x1e   :  { %454 = vmatpush.bf16.msra.mxu0 %v861_v28 }
  0x1f   :  { %468 = vmatpush.bf16.msra.mxu1 %v869_v29 }
  0x20   :  { %482 = vmatpush.bf16.msra.mxu2 %v877_v36 }
  0x21   :  { %496 = vmatpush.bf16.msra.mxu3 %v885_v37  ;;  %455 = vmatmul.bf16.vlgmr.msra.gmra.mxu0 %v636_v40 }
  0x22   :  { %503 = vmatpush.bf16.msrb.mxu0 %v900_v34  ;;  %469 = vmatmul.bf16.vlgmr.msra.gmra.mxu1 %v640_v43  ;;  %v910_v34 = vld [vmem:[%s1173_s4] ss:$0 sm:$0xff] }
  0x23   :  { %517 = vmatpush.bf16.msrb.mxu1 %v908_v35  ;;  %483 = vmatmul.bf16.vlgmr.msra.gmra.mxu2 %v644_v46 }
  0x24   :  { %497 = vmatmul.bf16.vlgmr.msra.gmra.mxu3 %v648_v47  ;;  %849 = vmatpush.msk.msrb.mxu2 %vm548_vm0, %v536_v2 }
  0x25   :  { %852 = vmatpush.msk.msrb.mxu3 %vm596_vm2, %v589_v33 }
  0x26   :  { %504 = vmatpush.bf16.msrb.mxu0 %v899_v44  ;;  %565 = vmatpush.msrb.mxu2 %v535_v3 }
  0x27   :  { %518 = vmatpush.bf16.msrb.mxu1 %v907_v45  ;;  %615 = vmatpush.msrb.mxu3 %v588_v41 }
  0x28   :  { %566 = vmatpush.msrb.mxu2 %v534_v4 }
  0x2a   :  { %505 = vmatpush.bf16.msrb.mxu0 %v898_v48  ;;  %567 = vmatpush.msrb.mxu2 %v533_v5 }
  0x2b   :  { %519 = vmatpush.bf16.msrb.mxu1 %v906_v49 }
  0x2e   :  { %506 = vmatpush.bf16.msrb.mxu0 %v897_v50 }
  0x2f   :  { %520 = vmatpush.bf16.msrb.mxu1 %v905_v51 }
  0x32   :  { %507 = vmatpush.bf16.msrb.mxu0 %v896_v52 }
  0x33   :  { %521 = vmatpush.bf16.msrb.mxu1 %v904_v53 }
  0x36   :  { %508 = vmatpush.bf16.msrb.mxu0 %v895_v54 }
  0x37   :  { %522 = vmatpush.bf16.msrb.mxu1 %v903_v55 }
  0x3a   :  { %509 = vmatpush.bf16.msrb.mxu0 %v894_v56 }
  0x3b   :  { %523 = vmatpush.bf16.msrb.mxu1 %v902_v57 }
  0x3e   :  { %510 = vmatpush.bf16.msrb.mxu0 %v893_v58 }
  0x3f   :  { %524 = vmatpush.bf16.msrb.mxu1 %v901_v59 }
  0x41   :  { %511 = vmatmul.bf16.vlgmr.msrb.gmra.mxu0 %v652_v0 }
  0x42   :  { %525 = vmatmul.bf16.vlgmr.msrb.gmra.mxu1 %v656_v1 }
  0x9e   :  { %v456_v6 = vpop.f32.mrf.mxu0 }
  0x9f   :  { %v470_v7 = vpop.f32.mrf.mxu1  ;;  %v457_v9 = vadd.f32 %v909_v8, %v456_v6 }
  0xa1   :  { %v471_v11 = vadd.f32 %v470_v7, %v457_v9 }
  0xa6   :  { %v484_v10 = vpop.f32.mrf.mxu2  ;;  %v458_v12 = vpop.f32.mrf.mxu0 }
  0xa7   :  { %v472_v13 = vpop.f32.mrf.mxu1  ;;  %v498_v14 = vpop.f32.mrf.mxu3  ;;  %v485_v15 = vadd.f32 %v484_v10, %v471_v11  ;;  %v459_v16 = vadd.f32 %v909_v8, %v458_v12 }
  0xa9   :  { %v499_v17 = vadd.f32 %v498_v14, %v485_v15  ;;  %v473_v18 = vadd.f32 %v472_v13, %v459_v16 }
  0xae   :  { %v486_v19 = vpop.f32.mrf.mxu2 }
  0xaf   :  { %v487_v23 = vadd.f32 %v486_v19, %v473_v18  ;;  %v500_v25 = vpop.f32.mrf.mxu3 }
  0xb1   :  { %v501_v27 = vadd.f32 %v500_v25, %v487_v23 }
  0xbe   :  { %v512_v20 = vpop.f32.mrf.mxu0 }
  0xbf   :  { %v526_v21 = vpop.f32.mrf.mxu1  ;;  %v513_v22 = vadd.f32 %v512_v20, %v499_v17 }
  0xc1   :  { %v527_v24 = vadd.f32 %v526_v21, %v513_v22 }
  0xc3   :  { %v531_v26 = vmax.f32 %v527_v24, 0.0 }
  0xc5   :  { %850 = vmatmul.msk.f32.vlgmr.msrb.gmra.mxu2 %vm541_vm1, %v531_v26 }
  0xc6   :  { %v514_v28 = vpop.f32.mrf.mxu0 }
  0xc7   :  { %v515_v29 = vadd.f32 %v514_v28, %v501_v27  ;;  %v528_v30 = vpop.f32.mrf.mxu1 }
  0xc9   :  { %v529_v31 = vadd.f32 %v528_v30, %v515_v29 }
  0xcb   :  { %v532_v32 = vmax.f32 %v529_v31, 0.0 }
  0xcd   :  { %851 = vmatmul.msk.f32.gmra.mxu2 %vm541_vm1, %v532_v32 }
 0x148   :  { %v569_v35 = vpop.f32.mrf.mxu2 }
 0x149   :  { %v570_v36 = vadd.f32 %v910_v34, %v569_v35 }
 0x14b   :  { %v576_v37 = vsel %vm575_vm3, %v570_v36, -inf }
 0x14c   :  { %577 = vmax.xlane.f32.xlu0 %v576_v37 }
 0x150   :  { %v572_v38 = vpop.f32.mrf.mxu2 }
 0x151   :  { %v573_v39 = vadd.f32 %v910_v34, %v572_v38 }
 0x153   :  { %v579_v40 = vsel %vm575_vm3, %v573_v39, -inf }
 0x154   :  { %580 = vmax.xlane.f32.xlu0 %v579_v40 }
 0x1bf   :  { %v578_v42 = vpop.xlane.xlu0 %577 }
 0x1c0   :  { %v582_v43 = vsub.f32 %v570_v36, %v578_v42 }
 0x1c2   :  { %v584_v44 = vmul.f32 1.442695, %v582_v43 }
 0x1c4   :  { %911 = vpow2.f32 %v584_v44 }
 0x1c7   :  { %v581_v45 = vpop.xlane.xlu0 %580 }
 0x1c8   :  { %v583_v46 = vsub.f32 %v573_v39, %v581_v45 }
 0x1ca   :  { %v912_v47 = vpop.eup %911  ;;  %v586_v48 = vmul.f32 1.442695, %v583_v46 }
 0x1cb   :  { %853 = vmatmul.msk.f32.vlgmr.msrb.gmra.mxu3 %vm575_vm3, %v912_v47 }
 0x1cc   :  { %913 = vpow2.f32 %v586_v48 }
 0x1d2   :  { %v914_v49 = vpop.eup %913 }
 0x1d3   :  { %854 = vmatmul.msk.f32.gmra.mxu3 %vm575_vm3, %v914_v49 }
 0x24e   :  { %v617_v50 = vpop.f32.mrf.mxu3 }
 0x24f   :  { %915 = vrcp.f32 %v617_v50 }
 0x255   :  { %v916_v51 = vpop.eup %915 }
 0x256   :  { %v625_v52 = vmul.f32 %v916_v51, %v912_v47  ;;  %v620_v53 = vpop.f32.mrf.mxu3 }
 0x257   :  { %917 = vrcp.f32 %v620_v53 }
 0x258   :  { %627 = vst.msk [vmem:[%s1176_s6] sm:$0xff] %vm575_vm3, %v625_v52 }
 0x25d   :  { %v918_v54 = vpop.eup %917 }
 0x25e   :  { %v626_v55 = vmul.f32 %v918_v54, %v914_v49 }
 0x260   :  { %628 = vst.msk [vmem:[%s1176_s6 + $0x8] sm:$0xff] %vm575_vm3, %v626_v55 }

</bundles_post_ra>
